<compile_context>
chip_gen: v7x
topology: tpu7x:2x2x1
jax: 0.10.0
libtpu: 0.0.40
codegen_flags: <defaults>
</compile_context>

<pallas_src>
import jax
import jax.numpy as jnp
from jax.experimental import pallas as pl
from jax.experimental.pallas import tpu as pltpu


def _eltwise_mul_kernel(x_ref, w_ref, o_ref):
    # x_ref: (row_tile, col_tile) data tile
    # w_ref: (1, col_tile)        weight tile, sublane-broadcast on the VPU
    o_ref[...] = x_ref[...] * w_ref[...]


def _round_down(x: int, unit: int) -> int:
    return (x // unit) * unit


def _round_up(x: int, unit: int) -> int:
    return ((x + unit - 1) // unit) * unit


def trainable_eltwise_forward(x: jax.Array, weights: jax.Array) -> jax.Array:
    """x: (B, C, H, W); weights: (1, C, H, W). Returns x * weights."""
    B, C, H, W = x.shape
    assert weights.shape == (1, C, H, W)
    N = C * H * W

    itemsize = jnp.dtype(x.dtype).itemsize
    sublane_unit = max(8, 32 // itemsize)      # 8 for f32, 16 for bf16, 32 for int8/fp8
    LANE = 128

    # Lane-dense flattened views (row-major reshape -> no data movement).
    x2 = x.reshape(B, N)
    w2 = weights.reshape(1, N).astype(x.dtype)

    # Pad the lane axis to a multiple of 128 so stores are never masked.
    N_pad = _round_up(N, LANE)
    if N_pad != N:
        x2 = jnp.pad(x2, ((0, 0), (0, N_pad - N)))
        w2 = jnp.pad(w2, ((0, 0), (0, N_pad - N)))

    # --- Tile selection (byte-budget driven) ---
    TILE_BYTE_BUDGET = 8 << 20  # 8 MiB/tile: x+out double-buffered ~= 32 MiB,
                                # comfortably under v7x's 64 MiB physical VMEM.

    # Row tile: full B when it fits, else the largest multiple of the dtype's
    # sublane unit under a byte-scaled cap; one masked partial last block is
    # far cheaper than many extra grid steps.
    row_cap = max(sublane_unit, (512 * 4) // itemsize)
    row_tile = B if B <= row_cap else _round_down(row_cap, sublane_unit)

    # Column tile: as wide as the byte budget allows, rounded to 128 lanes.
    col_budget = max(LANE, _round_down(TILE_BYTE_BUDGET // (row_tile * itemsize), LANE))
    col_tile = min(N_pad, col_budget)

    n_row = pl.cdiv(B, row_tile)
    n_col = pl.cdiv(N_pad, col_tile)

    # Megacore (v7x has 2 TensorCores): ensure at least 2 blocks along one
    # parallel axis. Prefer splitting the lane axis.
    if n_row * n_col == 1:
        if N_pad >= 2 * LANE:
            col_tile = _round_up(pl.cdiv(N_pad, 2), LANE)
            n_col = pl.cdiv(N_pad, col_tile)
        elif B >= 2 * sublane_unit:
            row_tile = _round_up(pl.cdiv(B, 2), sublane_unit)
            n_row = pl.cdiv(B, row_tile)

    tile_bytes = row_tile * col_tile * itemsize
    # Triple-buffer only when tiles are tiny AND there are enough grid steps
    # for the extra buffer to hide DMA latency jitter.
    use_triple = (tile_bytes < (2 << 20)) and (n_row * n_col >= 4)

    block = (row_tile, col_tile)
    if n_row == 1:
        # Degenerate row axis -> 1-D grid over column tiles only.
        grid = (n_col,)
        x_map = lambda c: (0, c)
        w_map = lambda c: (0, c)
        dims = ("parallel",)
    else:
        # Column tiles outer, row tiles inner: the weight block index is
        # constant along the inner axis, so it stays resident across it.
        grid = (n_col, n_row)
        x_map = lambda c, r: (r, c)
        w_map = lambda c, r: (0, c)
        dims = ("parallel", "parallel")

    if use_triple:
        x_spec = pl.BlockSpec(block, x_map, pipeline_mode=pl.Buffered(3))
        o_spec = pl.BlockSpec(block, x_map, pipeline_mode=pl.Buffered(3))
    else:
        x_spec = pl.BlockSpec(block, x_map)
        o_spec = pl.BlockSpec(block, x_map)
    w_spec = pl.BlockSpec((1, col_tile), w_map)

    bufs = 3 if use_triple else 2
    vmem_needed = 2 * bufs * tile_bytes + 2 * col_tile * itemsize
    # Floor 32 MiB (v5e default scoped VMEM is only 16 MiB); ceiling 56 MiB
    # (under v7x's 64 MiB physical VMEM).
    vmem_limit = int(min(max(vmem_needed + (4 << 20), 32 << 20), 56 << 20))

    out2 = pl.pallas_call(
        _eltwise_mul_kernel,
        out_shape=jax.ShapeDtypeStruct((B, N_pad), x.dtype),
        grid_spec=pltpu.PrefetchScalarGridSpec(
            num_scalar_prefetch=0,
            grid=grid,
            in_specs=[x_spec, w_spec],
            out_specs=o_spec,
        ),
        compiler_params=pltpu.CompilerParams(
            dimension_semantics=dims,
            vmem_limit_bytes=vmem_limit,
        ),
    )(x2, w2)

    if N_pad != N:
        out2 = out2[:, :N]
    return out2.reshape(B, C, H, W)


if __name__ == "__main__":
    # Module shapes: weights = (1, n, h, w); forward input x = (B, n, h, w).
    B, C, H, W = 2, 4, 16, 16

    key = jax.random.PRNGKey(0)
    kx, kw = jax.random.split(key)
    x = jax.random.normal(kx, (B, C, H, W), dtype=jnp.float32)
    # Deterministic init mirroring torch.randn(1, n, h, w)
    weights = jax.random.normal(kw, (1, C, H, W), dtype=jnp.float32)

    out = trainable_eltwise_forward(x, weights)
    out = jax.block_until_ready(out)

    # Correctness check against plain-JAX broadcasted multiply.
    ref = x * weights
    assert out.shape == (B, C, H, W)
    assert jnp.allclose(out, ref, atol=1e-6, rtol=1e-6)

    print("KERNEL_OK")
</pallas_src>

<mosaic_0001>
module attributes {stable_mosaic.version = 11 : i64} {
  func.func @_eltwise_mul_kernel(%arg0: i32, %arg1: memref<2x512xf32, #tpu.memory_space<vmem>>, %arg2: memref<1x512xf32, #tpu.memory_space<vmem>>, %arg3: memref<2x512xf32, #tpu.memory_space<vmem>>) attributes {dimension_semantics = [#tpu.dimension_semantics<parallel>], iteration_bounds = array<i64: 2>, scalar_prefetch = 0 : i64, scratch_operands = 0 : i64, tpu.core_type = #tpu.core_type<tc>, window_params = [{transform_indices = @transform_0, window_bounds = array<i64: 2, 512>}, {transform_indices = @transform_1, window_bounds = array<i64: 1, 512>}, {transform_indices = @transform_2, window_bounds = array<i64: 2, 512>}]} {
    %c0 = arith.constant 0 : index
    %c0_0 = arith.constant 0 : index
    %0 = vector.load %arg1[%c0, %c0_0] : memref<2x512xf32, #tpu.memory_space<vmem>>, vector<2x512xf32>
    %c0_1 = arith.constant 0 : index
    %c0_2 = arith.constant 0 : index
    %1 = vector.load %arg2[%c0_1, %c0_2] : memref<1x512xf32, #tpu.memory_space<vmem>>, vector<1x512xf32>
    %2 = vector.broadcast %1 : vector<1x512xf32> to vector<2x512xf32>
    %3 = arith.mulf %0, %2 : vector<2x512xf32>
    %c0_3 = arith.constant 0 : index
    %c0_4 = arith.constant 0 : index
    %4 = vector.load %arg3[%c0_3, %c0_4] : memref<2x512xf32, #tpu.memory_space<vmem>>, vector<2x512xf32>
    tpu.vector_store %arg3[%c0_3, %c0_4], %3 {strides = array<i32>} : memref<2x512xf32, #tpu.memory_space<vmem>>, vector<2x512xf32>,
    return
  }
  func.func @transform_0(%arg0: i32) -> (i32, i32) {
    %c0_i32 = arith.constant 0 : i32
    %c0_i32_0 = arith.constant 0 : i32
    return %c0_i32, %arg0 : i32, i32
  }
  func.func @transform_1(%arg0: i32) -> (i32, i32) {
    %c0_i32 = arith.constant 0 : i32
    %c0_i32_0 = arith.constant 0 : i32
    return %c0_i32, %arg0 : i32, i32
  }
  func.func @transform_2(%arg0: i32) -> (i32, i32) {
    %c0_i32 = arith.constant 0 : i32
    %c0_i32_0 = arith.constant 0 : i32
    return %c0_i32, %arg0 : i32, i32
  }
}

</mosaic_0001>

<bundles_post_ra>
// kernel: tpu_custom_call.1
= control target key start
LH: loop header
LB: loop body
LE: loop exit
PB: predicated region body
PF: predicated region fallthrough
CT: control target
= control target key end

     0   :  { %7 = vsyncpa [#allocation3], 0  ;;  %s780_s0 = inlined_call_operand.hbm [shape: f32[2,1024], index: 0, kind: input, shape index: {}]   ;;  %s781_s1 = inlined_call_operand.hbm [shape: f32[1,1024], index: 1, kind: input, shape index: {}]   ;;  %s782_s2 = inlined_call_operand.hbm [shape: f32[2,1024], index: 2, kind: output, shape index: {}]  }
   0x1   :  { %9 = vsyncpa [#allocation3 + $0x1], 0 }
   0x2   :  { %10 = vsyncpa [#allocation6], 0 }
   0x3   :  { %12 = vsyncpa [#allocation6 + $0x1], 0 }
   0x4   :  { %13 = vsyncpa [#allocation4], 0 }
   0x5   :  { %15 = vsyncpa [#allocation4 + $0x1], 0  ;;  %s572_s9 = smov 0   ;;  %s574_s10 = smov 0  }
   0x6   :  { %s576_s11 = smov 0   ;;  %s578_s12 = smov 0  }
   0x7 LB: > { %s593_s13 = sadd.s32 4294967295, %s551_s12   ;;  %s348_s14 = sadd.s32 4294967294, %s551_s12   ;;  %s551_s12 = sphi %s578_s12, %s801_s12   ;;  %s547_s11 = sphi %s576_s11, %s800_s11   ;;  %s543_s10 = sphi %s574_s10, %s799_s10   ;;  %s539_s9 = sphi %s572_s9, %s798_s9  }
   0x8   : > { %s597_s15 = sadd.s32 1, %s551_s12   ;;  %s28_s16 = sadd.s32 1, %s547_s11 }
   0x9   : > { %s25_s17 = ssub.s32 %s551_s12, %s597_s15  ;;  %p35_p0 = scmp.ne.s32.totalorder %s547_s11, %s543_s10 }
   0xa   : > { %p26_p1 = scmp.eq.s32.totalorder %s25_s17, 0  ;;  %p36_p2 = scmp.eq.s32.totalorder %s551_s12, 0 }
   0xb   : > { %p41_p3 = scmp.ne.s32.totalorder %s543_s10, %s539_s9  ;;  %p42_p4 = scmp.eq.s32.totalorder %s593_s13, 0 }
   0xc   : > { %s609_s18 = scalar_select %p26_p1, %s547_s11, %s28_s16  }
   0xd   : > { %p611_p5 = por %p36_p2, %p35_p0  ;;  %p615_p6 = por %p42_p4, %p41_p3 }
   0xe   : > { %p91_p7 = scmp.eq.s32.totalorder %s593_s13, 1  ;;  %p97_p8 = scmp.eq.s32.totalorder %s348_s14, 1 }
   0xf   : > { %s786_s20 = scalar_select %p615_p6, 1, 0 }
  0x10   : > { %p386_p10 = scmp.lt.s32.totalorder %s551_s12, 2  ;;  %p622_p11 = por %p91_p7, %p35_p0 }
  0x11   : > { %p626_p12 = por %p97_p8, %p41_p3  ;;  %s631_s23 = sand.u32 1, %s547_s11  }
  0x12   : > { %s787_s21 = scalar_select %p622_p11, 1, 0 }
  0x13   : > { %s788_s22 = scalar_select %p626_p12, 1, 0 }
  0x14   : > { %s366_s24 = sshll.u32 %s551_s12, 7  ;;  %s351_s25 = sshll.u32 %s631_s23, 3 }
  0x15   : > { %s638_s28 = scalar_lea.hbm %s780_s0, %s366_s24  ;;  %s121_s29 = scalar_lea.vmem [#allocation2], %s351_s25 }
  0x16   : > { %s129_s30 = sshll.u32 %s121_s29, 4  ;;  %p642_p13 = pnand %p386_p10, %p611_p5  ;;  %s646_s30 = int_to_ptr.vmem [resolvable:$true] %s129_s30 }
  0x17   : > { %s118_s4 = scalar_lea.sflag [#allocation3], %s631_s23  ;;  %s421_s5 = scalar_lea.hbm %s638_s28, 128 }
  0x18   : > { %p422_p2 = scmp.ne.s32.totalorder %s638_s28, %s421_s5  ;;  %p423_p3 = pneg %p642_p13 }
  0x19   : > { %s426_s8 = scalar_lea.hbm %s780_s0, 256  ;;  %p427_p5 = scmp.lt.u32.totalorder %s638_s28, %s780_s0 }
  0x1a   : > { %p424_p4 = pnand %p423_p3, %p422_p2  ;;  %p428_p8 = scmp.lt.u32.totalorder %s426_s8, %s421_s5 }
  0x1b   : > { %p430_p9 = scmp.lt.u32.totalorder %s421_s5, %s638_s28 }
  0x1c   : > { %p425_p7 = pneg %p424_p4  ;;  %p429_p10 = por %p428_p8, %p427_p5 }
  0x1e   : > { %p431_p0 = por %p430_p9, %p429_p10 }
  0x20   : > { %p432_p1 = pnand %p431_p0, %p425_p7 }
  0x22   : > { %435 = shalt.err (!%p432_p1)
}
  0x23   : > { %s436_s17 = scalar_lea.vmem %s646_s30, 128  ;;  %s553_s19 = smov [#allocation2]  }
  0x24   : > { %p437_p2 = scmp.ne.s32.totalorder %s646_s30, %s436_s17  ;;  %s441_s24 = sshll.u32 %s553_s19, 4  ;;  %s442_s24 = int_to_ptr.vmem [resolvable:$false] %s441_s24 }
  0x25   : > { %s443_s25 = scalar_lea.vmem %s442_s24, 256  ;;  %p444_p11 = scmp.lt.s32.totalorder %s646_s30, %s442_s24 }
  0x26   : > { %p439_p4 = pnand %p437_p2, %p423_p3  ;;  %p445_p5 = scmp.lt.s32.totalorder %s443_s25, %s436_s17 }
  0x28   : > { %p440_p12 = pneg %p439_p4  ;;  %p446_p8 = por %p445_p5, %p444_p11 }
  0x2a   : > { %p447_p9 = pnand %p446_p8, %p440_p12 }
  0x2c   : > { %450 = shalt.err (!%p447_p9)
}
  0x2d   : > { %378 = dma.hbm_to_vmem [thread:$0]  (!%p642_p13), %s638_s28, 128, %s646_s30, %s118_s4  }
  0x2e   : > { %p790_p0 = scmp.lt.s32.totalorder %s551_s12, 3  ;;  %p791_p1 = scmp.ge.s32.totalorder %s551_s12, 1 }
  0x2f   : > { %s354_s27 = sshll.u32 %s631_s23, 2  ;;  %s367_s29 = sshll.u32 %s551_s12, 6 }
  0x30   : > { %p680_p7 = pnand %p791_p1, %p790_p0  ;;  %s689_s7 = scalar_lea.hbm %s781_s1, %s367_s29 }
  0x31   : > { %s140_s8 = scalar_lea.vmem [#allocation5], %s354_s27  ;;  %s137_s28 = scalar_lea.sflag [#allocation6], %s631_s23 }
  0x32   : > { %s792_s26 = scalar_select %p680_p7, 1, 0 }
  0x33   : > { %s148_s14 = sshll.u32 %s140_s8, 4  ;;  %s451_s30 = scalar_lea.hbm %s689_s7, 64  ;;  %s149_s14 = int_to_ptr.vmem [resolvable:$true] %s148_s14 }
  0x34   : > { %p452_p11 = scmp.ne.s32.totalorder %s689_s7, %s451_s30  ;;  %s456_s17 = scalar_lea.hbm %s781_s1, 128 }
  0x35   : > { %p457_p2 = scmp.lt.u32.totalorder %s689_s7, %s781_s1  ;;  %p458_p4 = scmp.lt.u32.totalorder %s456_s17, %s451_s30 }
  0x36   : > { %p454_p12 = pnand %p452_p11, %p423_p3  ;;  %p460_p8 = scmp.lt.u32.totalorder %s451_s30, %s689_s7 }
  0x37   : > { %p459_p5 = por %p458_p4, %p457_p2 }
  0x38   : > { %p455_p10 = pneg %p454_p12 }
  0x39   : > { %p461_p9 = por %p460_p8, %p459_p5 }
  0x3b   : > { %p462_p0 = pnand %p461_p9, %p455_p10 }
  0x3d   : > { %465 = shalt.err (!%p462_p0)
}
  0x3e   : > { %s466_s23 = scalar_lea.vmem %s149_s14, 64  ;;  %s554_s25 = smov [#allocation5]  }
  0x3f   : > { %p467_p1 = scmp.ne.s32.totalorder %s149_s14, %s466_s23  ;;  %s471_s27 = sshll.u32 %s554_s25, 4  ;;  %s472_s27 = int_to_ptr.vmem [resolvable:$false] %s471_s27 }
  0x40   : > { %s473_s29 = scalar_lea.vmem %s472_s27, 128  ;;  %p474_p6 = scmp.lt.s32.totalorder %s149_s14, %s472_s27 }
  0x41   : > { %p469_p11 = pnand %p467_p1, %p423_p3  ;;  %p475_p7 = scmp.lt.s32.totalorder %s473_s29, %s466_s23 }
  0x43   : > { %p470_p12 = pneg %p469_p11  ;;  %p476_p2 = por %p475_p7, %p474_p6 }
  0x45   : > { %p477_p4 = pnand %p476_p2, %p470_p12 }
  0x47   : > { %480 = shalt.err (!%p477_p4)
}
  0x48   : > { %381 = dma.hbm_to_vmem [thread:$0]  (!%p642_p13), %s689_s7, 64, %s149_s14, %s137_s28  }
  0x49   : > { %p793_p10 = scmp.ne.s32.totalorder %s792_s26, 0 }
  0x4a   : > { %s714_s5 = sand.u32 (!%p793_p10), 1, %s543_s10   ;;  %p794_p6 = scmp.ne.s32.totalorder (!%p793_p10), %s786_s20, 0 }
  0x4b   : > { %157 = sbr.rel (%p793_p10) target bundleno = 116 (0x74), region = 28  ;;  %s358_s6 = sshll.u32 (!%p793_p10), %s714_s5, 3 }
  0x4c   : > { %s160_s8 = scalar_lea.sflag (!%p793_p10), [#allocation3], %s714_s5  ;;  %s163_s30 = scalar_lea.vmem (!%p793_p10), [#allocation2], %s358_s6 }
  0x52   : > { %526 = dma.done.wait (%p794_p6), %s160_s8, 128  }
  0x53   : > { %528 = vsyncadd (%p794_p6), %s160_s8, 4294967168  ;;  %s359_s3 = sshll.u32 %s714_s5, 2  ;;  %s169_s26 = scalar_lea.sflag [#allocation6], %s714_s5 }
  0x54   : > { %s172_s7 = scalar_lea.vmem [#allocation5], %s359_s3 }
  0x55   : > { %530 = dma.done.wait (%p794_p6), %s169_s26, 64  }
  0x56   : > { %532 = vsyncadd (%p794_p6), %s169_s26, 4294967232  ;;  %v204_v0 = vlaneseq  ;;  %v555_v1 = vmov 1983009808   ;;  %v202_v9 = vld [vmem:[%s172_s7] sm:$0xf]  ;;  %v201_v19 = vld [vmem:[%s163_s30] sm:$0xff] }
  0x57   : > { %v223_v2 = vunpack.c.l.s4 %v555_v1  ;;  %s197_s20 = scalar_lea.vmem [#allocation7], %s358_s6  ;;  %s368_s28 = sshll.u32 %s593_s13, 7 }
  0x58   : > { %v205_v3 = vshrl.u32 %v204_v0, 7  ;;  %s255_s14 = sshll.u32 %s197_s20, 4  ;;  %s738_s17 = scalar_lea.hbm %s782_s2, %s368_s28  ;;  %s733_s14 = int_to_ptr.vmem [resolvable:$true] %s255_s14 }
  0x59   : > { %v224_v4 = vunpack.c.0.s8 %v223_v2  ;;  %s241_s19 = scalar_lea.sflag [#allocation4], %s714_s5  ;;  %s481_s24 = scalar_lea.vmem %s733_s14, 128 }
  0x5a   : > { %v206_v5 = vsub.s32 0, %v205_v3  ;;  %v210_v6 = vsub.s32 1, %v205_v3  ;;  %v214_v7 = vsub.s32 2, %v205_v3  ;;  %v218_v8 = vsub.s32 3, %v205_v3  ;;  %p482_p13 = scmp.ne.s32.totalorder %s733_s14, %s481_s24  ;;  %p795_p3 = scmp.ne.s32.totalorder %s787_s21, 0 }
  0x5b   : > { %v227_v10 = vsub.s32 %v224_v4, %v205_v3  ;;  %s556_s13 = smov [#allocation7]  }
  0x5c   : > { %v207_v11 = vrot.slane %v202_v9, %v206_v5  ;;  %v211_v12 = vrot.slane %v202_v9, %v210_v6  ;;  %v215_v13 = vrot.slane %v202_v9, %v214_v7  ;;  %v219_v14 = vrot.slane %v202_v9, %v218_v8  ;;  %p483_p7 = pnand %p482_p13, %p795_p3  ;;  %s485_s23 = sshll.u32 %s556_s13, 4  ;;  %s486_s23 = int_to_ptr.vmem [resolvable:$false] %s485_s23 }
  0x5d   : > { %s487_s25 = scalar_lea.vmem %s486_s23, 256  ;;  %p488_p8 = scmp.lt.s32.totalorder %s733_s14, %s486_s23 }
  0x5e   : > { %v220_v15 = vcombine.low %v207_v11, %v211_v12  ;;  %v221_v16 = vcombine.low %v215_v13, %v219_v14  ;;  %p484_p5 = pneg %p483_p7  ;;  %p489_p9 = scmp.lt.s32.totalorder %s487_s25, %s481_s24 }
  0x60   : > { %v228_v17 = vrot.slane %v220_v15, %v227_v10  ;;  %v235_v18 = vrot.slane %v221_v16, %v227_v10  ;;  %p490_p0 = por %p489_p9, %p488_p8 }
  0x62   : > { %v236_v20 = vcombine.low %v228_v17, %v235_v18  ;;  %p491_p1 = pnand %p490_p0, %p484_p5 }
  0x64   : > { %v238_v21 = vmul.f32 %v236_v20, %v201_v19 }
  0x66   : > { %239 = vst [vmem:[%s197_s20] sm:$0xff] %v238_v21 }
  0x67   : > { %494 = shalt.err (!%p491_p1)
}
  0x68   : > { %s495_s27 = scalar_lea.hbm %s738_s17, 128  ;;  %s499_s6 = scalar_lea.hbm %s782_s2, 256 }
  0x69   : > { %p496_p11 = scmp.ne.s32.totalorder %s738_s17, %s495_s27  ;;  %p500_p4 = scmp.lt.u32.totalorder %s738_s17, %s782_s2 }
  0x6a   : > { %p501_p10 = scmp.lt.u32.totalorder %s499_s6, %s495_s27  ;;  %p503_p13 = scmp.lt.u32.totalorder %s495_s27, %s738_s17 }
  0x6b   : > { %p497_p12 = pnand %p496_p11, %p795_p3 }
  0x6c   : > { %p502_p6 = por %p501_p10, %p500_p4 }
  0x6d   : > { %p498_p2 = pneg %p497_p12 }
  0x6e   : > { %p504_p7 = por %p503_p13, %p502_p6 }
  0x70   : > { %p505_p5 = pnand %p504_p7, %p498_p2 }
  0x72   : > { %508 = shalt.err (!%p505_p5)
}
  0x73   : > { %373 = dma.vmem_to_hbm [thread:$0]  (%p795_p3), %s733_s14, 128, %s738_s17, %s241_s19  }
  0x74 PF: > { %s267_s3 = sand.u32 1, %s539_s9   ;;  %p796_p8 = scmp.ne.s32.totalorder %s788_s22, 0 }
  0x75   : > { %p797_p9 = scmp.ge.s32.totalorder %s551_s12, 2  ;;  %s268_s26 = scalar_lea.sflag [#allocation4], %s267_s3 }
  0x77   : > { %p383_p0 = pnand %p797_p9, %p796_p8 }
  0x79   : > { %534 = dma.done.wait (!%p383_p0), %s268_s26, 128  }
  0x7a   : > { %536 = vsyncadd (!%p383_p0), %s268_s26, 4294967168  ;;  %p18_p1 = scmp.ge.s32.totalorder %s597_s15, 4   ;;  %s798_s9 = smov %s543_s10 }
  0x7b   : > { %s799_s10 = smov %s547_s11  ;;  %s800_s11 = smov %s609_s18 }
  0x7c   : > { %s801_s12 = smov %s597_s15  ;;  %20 = sbr.rel (!%p18_p1) target bundleno = 7 (0x7), region = 86 }
  0x83   :  { %273 = vsyncpa [#allocation3], 1 }
  0x84   :  { %275 = vsyncpa [#allocation3 + $0x1], 1 }
  0x85   :  { %276 = vsyncpa [#allocation6], 1 }
  0x86   :  { %278 = vsyncpa [#allocation6 + $0x1], 1 }
  0x87   :  { %279 = vsyncpa [#allocation4], 1 }
  0x88   :  { %281 = vsyncpa [#allocation4 + $0x1], 1 }

</bundles_post_ra>
